<compile_context>
chip_gen: v6e
topology: v6e:2x2x1
jax: 0.10.0
libtpu: 0.0.40
codegen_flags: <defaults>
</compile_context>

<pallas_src>
import functools
import math

import jax
import jax.numpy as jnp
from jax import lax
from jax.experimental import pallas as pl
from jax.experimental.pallas import tpu as pltpu


# ---------------------------------------------------------------------------
# Fused kernel: QKV projection + multi-head attention for ONE batch element.
#   q_ref: (q_len, dim)    k_ref/v_ref: (k_len, dim)
#   w_ref: (3*dim, dim)    stacked [Wq; Wk; Wv] (nn.Linear layout, out x in)
#   o_ref: (q_len, dim)    heads concatenated along the feature (lane) axis
# ---------------------------------------------------------------------------
def _mha_fused_kernel(q_ref, k_ref, v_ref, w_ref, o_ref, *, num_heads):
    dim = o_ref.shape[-1]
    head_dim = dim // num_heads
    q_len = q_ref.shape[0]
    k_len = k_ref.shape[0]

    # x @ W^T as a direct MXU contraction (no in-kernel transpose of W).
    dn = (((1,), (1,)), ((), ()))
    q_p = lax.dot_general(q_ref[...], w_ref[0:dim, :], dn,
                          preferred_element_type=jnp.float32)
    k_p = lax.dot_general(k_ref[...], w_ref[dim:2 * dim, :], dn,
                          preferred_element_type=jnp.float32)
    v_p = lax.dot_general(v_ref[...], w_ref[2 * dim:3 * dim, :], dn,
                          preferred_element_type=jnp.float32)

    # Per-head views; all heads of this batch processed in batched einsums.
    qh = q_p.reshape(q_len, num_heads, head_dim)
    kh = k_p.reshape(k_len, num_heads, head_dim)
    vh = v_p.reshape(k_len, num_heads, head_dim)

    scale = 1.0 / math.sqrt(head_dim)
    s = jnp.einsum("qhd,khd->hqk", qh, kh,
                   preferred_element_type=jnp.float32) * scale
    # TODO(synk): optional boolean `mask` (masked_fill with -inf) not implemented;
    # the reference default is mask=None.
    s = s - jnp.max(s, axis=-1, keepdims=True)
    p = jnp.exp(s)
    p = p * pl.reciprocal(jnp.sum(p, axis=-1, keepdims=True), approx=True)
    o = jnp.einsum("hqk,khd->qhd", p, vh, preferred_element_type=jnp.float32)

    # Lane-dense write: (q_len, num_heads*head_dim) == (q_len, dim).
    o_ref[...] = o.reshape(q_len, dim).astype(o_ref.dtype)


# ---------------------------------------------------------------------------
# Host wrapper: single pallas_call, grid over batch, no HBM transposes.
# ---------------------------------------------------------------------------
def multihead_attention(q, k, v, wq, wk, wv, num_heads):
    """q,k,v: (seq_len, bsz, dim) — PyTorch layout. Returns (q_len, bsz, dim)."""
    q_len, bsz, dim = q.shape
    k_len = k.shape[0]
    assert dim % num_heads == 0
    # Per-batch column blocks of the (len, bsz*dim) view need dim % 128 == 0
    # (lane tiling) unless bsz == 1; module default dim=512 satisfies this.

    # Stack projection weights: one resident VMEM block serves all three matmuls.
    w_qkv = jnp.concatenate([wq, wk, wv], axis=0)  # (3*dim, dim)

    # Free contiguous reshapes (no data movement): the per-batch (len, dim) slab
    # is columns [b*dim : (b+1)*dim] of this 2-D view.
    q2 = q.reshape(q_len, bsz * dim)
    k2 = k.reshape(k_len, bsz * dim)
    v2 = v.reshape(k_len, bsz * dim)

    kernel = functools.partial(_mha_fused_kernel, num_heads=num_heads)
    out2 = pl.pallas_call(
        kernel,
        out_shape=jax.ShapeDtypeStruct((q_len, bsz * dim), q.dtype),
        grid=(bsz,),
        in_specs=[
            pl.BlockSpec((q_len, dim), lambda b: (0, b)),
            pl.BlockSpec((k_len, dim), lambda b: (0, b)),
            pl.BlockSpec((k_len, dim), lambda b: (0, b)),
            # Full weight block with a constant index_map -> stays resident in
            # VMEM across all grid steps (DMA'd once).
            pl.BlockSpec((3 * dim, dim), lambda b: (0, 0)),
        ],
        out_specs=pl.BlockSpec((q_len, dim), lambda b: (0, b)),
        compiler_params=pltpu.CompilerParams(
            dimension_semantics=("parallel",),  # shard batches across TCs
        ),
    )(q2, k2, v2, w_qkv)

    return out2.reshape(q_len, bsz, dim)


# ---------------------------------------------------------------------------
# Pure-JAX reference (mirrors the PyTorch forward exactly) for verification.
# ---------------------------------------------------------------------------
def _reference(q, k, v, wq, wk, wv, num_heads):
    q_len, bsz, dim = q.shape
    k_len = k.shape[0]
    head_dim = dim // num_heads
    qp = (q @ wq.T).reshape(q_len, bsz * num_heads, head_dim).transpose(1, 0, 2)
    kp = (k @ wk.T).reshape(k_len, bsz * num_heads, head_dim).transpose(1, 0, 2)
    vp = (v @ wv.T).reshape(k_len, bsz * num_heads, head_dim).transpose(1, 0, 2)
    score = (qp @ kp.transpose(0, 2, 1)) / math.sqrt(head_dim)
    score = jax.nn.softmax(score, axis=-1)
    out = (score @ vp).transpose(1, 0, 2).reshape(q_len, bsz, dim)
    return out


if __name__ == "__main__":
    dim, num_heads = 128, 4
    q_len = k_len = 8
    bsz = 2

    key = jax.random.PRNGKey(0)
    kq, kk, kv, kwq, kwk, kwv, kwo = jax.random.split(key, 7)

    q = jax.random.normal(kq, (q_len, bsz, dim), dtype=jnp.float32)
    k = jax.random.normal(kk, (k_len, bsz, dim), dtype=jnp.float32)
    v = jax.random.normal(kv, (k_len, bsz, dim), dtype=jnp.float32)

    # nn.Linear weights, shape (out_features, in_features).
    wq = jax.random.normal(kwq, (dim, dim), dtype=jnp.float32) / math.sqrt(dim)
    wk = jax.random.normal(kwk, (dim, dim), dtype=jnp.float32) / math.sqrt(dim)
    wv = jax.random.normal(kwv, (dim, dim), dtype=jnp.float32) / math.sqrt(dim)
    # self.out exists in __init__ but is never used in forward; kept for parity.
    wo = jax.random.normal(kwo, (dim, dim), dtype=jnp.float32) / math.sqrt(dim)

    out = multihead_attention(q, k, v, wq, wk, wv, num_heads)
    out = jax.block_until_ready(out)

    ref = _reference(q, k, v, wq, wk, wv, num_heads)
    assert out.shape == (q_len, bsz, dim)
    # Slightly loose tolerance: softmax denominator uses the EUP approximate
    # reciprocal (pl.reciprocal(approx=True)).
    assert jnp.allclose(out, ref, atol=5e-3, rtol=5e-3), "mismatch vs reference"

    print("KERNEL_OK")
</pallas_src>

<mosaic_0001>
module attributes {stable_mosaic.version = 11 : i64} {
  func.func @_mha_fused_kernel(%arg0: i32, %arg1: memref<8x128xf32, #tpu.memory_space<vmem>>, %arg2: memref<8x128xf32, #tpu.memory_space<vmem>>, %arg3: memref<8x128xf32, #tpu.memory_space<vmem>>, %arg4: memref<384x128xf32, #tpu.memory_space<vmem>>, %arg5: memref<8x128xf32, #tpu.memory_space<vmem>>) attributes {dimension_semantics = [#tpu.dimension_semantics<parallel>], iteration_bounds = array<i64: 2>, scalar_prefetch = 0 : i64, scratch_operands = 0 : i64, tpu.core_type = #tpu.core_type<tc>, window_params = [{transform_indices = @transform_0, window_bounds = array<i64: 8, 128>}, {transform_indices = @transform_1, window_bounds = array<i64: 8, 128>}, {transform_indices = @transform_2, window_bounds = array<i64: 8, 128>}, {pipeline_mode = #tpu.pipeline_mode<synchronous>, transform_indices = @transform_3, window_bounds = array<i64: 384, 128>}, {transform_indices = @transform_4, window_bounds = array<i64: 8, 128>}]} {
    %c0 = arith.constant 0 : index
    %c0_0 = arith.constant 0 : index
    %0 = vector.load %arg1[%c0, %c0_0] : memref<8x128xf32, #tpu.memory_space<vmem>>, vector<8x128xf32>
    %c0_1 = arith.constant 0 : index
    %c0_2 = arith.constant 0 : index
    %1 = vector.load %arg4[%c0_1, %c0_2] : memref<384x128xf32, #tpu.memory_space<vmem>>, vector<128x128xf32>
    %cst = arith.constant dense<0.000000e+00> : vector<8x128xf32>
    %2 = tpu.matmul %0, %1, %cst {dimension_numbers = #tpu.dot_dimension_numbers<[1], [1], [0], [0], [0, 0, 1, 0], [], []>} : vector<8x128xf32>, vector<128x128xf32>, vector<8x128xf32> -> vector<8x128xf32>
    %c0_3 = arith.constant 0 : index
    %c0_4 = arith.constant 0 : index
    %3 = vector.load %arg2[%c0_3, %c0_4] : memref<8x128xf32, #tpu.memory_space<vmem>>, vector<8x128xf32>
    %c128 = arith.constant 128 : index
    %c0_5 = arith.constant 0 : index
    %4 = vector.load %arg4[%c128, %c0_5] : memref<384x128xf32, #tpu.memory_space<vmem>>, vector<128x128xf32>
    %cst_6 = arith.constant dense<0.000000e+00> : vector<8x128xf32>
    %5 = tpu.matmul %3, %4, %cst_6 {dimension_numbers = #tpu.dot_dimension_numbers<[1], [1], [0], [0], [0, 0, 1, 0], [], []>} : vector<8x128xf32>, vector<128x128xf32>, vector<8x128xf32> -> vector<8x128xf32>
    %c0_7 = arith.constant 0 : index
    %c0_8 = arith.constant 0 : index
    %6 = vector.load %arg3[%c0_7, %c0_8] : memref<8x128xf32, #tpu.memory_space<vmem>>, vector<8x128xf32>
    %c256 = arith.constant 256 : index
    %c0_9 = arith.constant 0 : index
    %7 = vector.load %arg4[%c256, %c0_9] : memref<384x128xf32, #tpu.memory_space<vmem>>, vector<128x128xf32>
    %cst_10 = arith.constant dense<0.000000e+00> : vector<8x128xf32>
    %8 = tpu.matmul %6, %7, %cst_10 {dimension_numbers = #tpu.dot_dimension_numbers<[1], [1], [0], [0], [0, 0, 1, 0], [], []>} : vector<8x128xf32>, vector<128x128xf32>, vector<8x128xf32> -> vector<8x128xf32>
    %9 = vector.shape_cast %2 : vector<8x128xf32> to vector<8x4x32xf32>
    %10 = vector.shape_cast %5 : vector<8x128xf32> to vector<8x4x32xf32>
    %11 = vector.shape_cast %8 : vector<8x128xf32> to vector<8x4x32xf32>
    "tpu.trace_start"() <{level = 10 : i32, message = "qhd,khd->hqk"}> : () -> ()
    %cst_11 = arith.constant dense<0.000000e+00> : vector<4x8x8xf32>
    %12 = tpu.matmul %9, %10, %cst_11 {dimension_numbers = #tpu.dot_dimension_numbers<[2], [2], [0], [0], [0, 1, 0, 0, 1, 0], [1], [1]>} : vector<8x4x32xf32>, vector<8x4x32xf32>, vector<4x8x8xf32> -> vector<4x8x8xf32>
    "tpu.trace_stop"() : () -> ()
    %cst_12 = arith.constant 0.176776692 : f32
    %13 = vector.broadcast %cst_12 : f32 to vector<4x8x8xf32>
    %14 = arith.mulf %12, %13 : vector<4x8x8xf32>
    %cst_13 = arith.constant dense<0xFF800000> : vector<4x8xf32>
    %15 = vector.multi_reduction <maximumf>, %14, %cst_13 [2] : vector<4x8x8xf32> to vector<4x8xf32>
    %16 = vector.shape_cast %15 : vector<4x8xf32> to vector<4x8x1xf32>
    %17 = vector.broadcast %16 : vector<4x8x1xf32> to vector<4x8x8xf32>
    %18 = arith.subf %14, %17 : vector<4x8x8xf32>
    %19 = math.exp %18 : vector<4x8x8xf32>
    %cst_14 = arith.constant dense<0.000000e+00> : vector<4x8xf32>
    %20 = vector.multi_reduction <add>, %19, %cst_14 [2] : vector<4x8x8xf32> to vector<4x8xf32>
    %21 = vector.shape_cast %20 : vector<4x8xf32> to vector<4x8x1xf32>
    %22 = tpu.reciprocal %21 {approx = true} : vector<4x8x1xf32> -> vector<4x8x1xf32>
    %23 = vector.broadcast %22 : vector<4x8x1xf32> to vector<4x8x8xf32>
    %24 = arith.mulf %19, %23 : vector<4x8x8xf32>
    "tpu.trace_start"() <{level = 10 : i32, message = "hqk,khd->qhd"}> : () -> ()
    %cst_15 = arith.constant dense<0.000000e+00> : vector<4x32x8xf32>
    %25 = tpu.matmul %11, %24, %cst_15 {dimension_numbers = #tpu.dot_dimension_numbers<[0], [2], [2], [1], [0, 1, 0, 2, 1, 1], [1], [0]>} : vector<8x4x32xf32>, vector<4x8x8xf32>, vector<4x32x8xf32> -> vector<4x32x8xf32>
    %26 = tpu.transpose %25, [2, 0, 1] : vector<4x32x8xf32> -> vector<8x4x32xf32>
    "tpu.trace_stop"() : () -> ()
    %27 = vector.shape_cast %26 : vector<8x4x32xf32> to vector<8x128xf32>
    %c0_16 = arith.constant 0 : index
    %c0_17 = arith.constant 0 : index
    %28 = vector.load %arg5[%c0_16, %c0_17] : memref<8x128xf32, #tpu.memory_space<vmem>>, vector<8x128xf32>
    tpu.vector_store %arg5[%c0_16, %c0_17], %27 {strides = array<i32>} : memref<8x128xf32, #tpu.memory_space<vmem>>, vector<8x128xf32>,
    return
  }
  func.func @transform_0(%arg0: i32) -> (i32, i32) {
    %c0_i32 = arith.constant 0 : i32
    %c0_i32_0 = arith.constant 0 : i32
    return %c0_i32, %arg0 : i32, i32
  }
  func.func @transform_1(%arg0: i32) -> (i32, i32) {
    %c0_i32 = arith.constant 0 : i32
    %c0_i32_0 = arith.constant 0 : i32
    return %c0_i32, %arg0 : i32, i32
  }
  func.func @transform_2(%arg0: i32) -> (i32, i32) {
    %c0_i32 = arith.constant 0 : i32
    %c0_i32_0 = arith.constant 0 : i32
    return %c0_i32, %arg0 : i32, i32
  }
  func.func @transform_3(%arg0: i32) -> (i32, i32) {
    %c0_i32 = arith.constant 0 : i32
    %c0_i32_0 = arith.constant 0 : i32
    %c0_i32_1 = arith.constant 0 : i32
    return %c0_i32, %c0_i32_0 : i32, i32
  }
  func.func @transform_4(%arg0: i32) -> (i32, i32) {
    %c0_i32 = arith.constant 0 : i32
    %c0_i32_0 = arith.constant 0 : i32
    return %c0_i32, %arg0 : i32, i32
  }
}

</mosaic_0001>

<bundles_post_ra>
// kernel: tpu_custom_call.1
= control target key start
LH: loop header
LB: loop body
LE: loop exit
PB: predicated region body
PF: predicated region fallthrough
CT: control target
= control target key end

     0   :  { %s3022_s0 = inlined_call_operand.hbm [shape: f32[8,256], index: 0, kind: input, shape index: {}]   ;;  %s3023_s1 = inlined_call_operand.hbm [shape: f32[8,256], index: 1, kind: input, shape index: {}]   ;;  %s3024_s2 = inlined_call_operand.hbm [shape: f32[8,256], index: 2, kind: input, shape index: {}]   ;;  %s3025_s3 = inlined_call_operand.hbm [shape: f32[384,128], index: 3, kind: input, shape index: {}]   ;;  %s3026_s4 = inlined_call_operand.hbm [shape: f32[8,256], index: 4, kind: output, shape index: {}]  }
   0x1   :  { %3038 = sst [smem:[#allocation20_spill]] %s3023_s1 }
   0x2   :  { %9 = vsyncpa [#allocation3], 0 }
   0x3   :  { %11 = vsyncpa [#allocation3 + $0x1], 0 }
   0x4   :  { %12 = vsyncpa [#allocation6], 0 }
   0x5   :  { %14 = vsyncpa [#allocation6 + $0x1], 0 }
   0x6   :  { %15 = vsyncpa [#allocation9], 0 }
   0x7   :  { %16 = vsyncpa [#allocation4], 0 }
   0x8   :  { %18 = vsyncpa [#allocation4 + $0x1], 0  ;;  %s2633_s15 = smov 0   ;;  %s2635_s16 = smov 0  }
   0x9   :  { %s2637_s17 = smov 0   ;;  %s2639_s18 = smov 0  }
   0xa LB: > { %3039 = sst [smem:[#allocation15_spill]] %s2580_s15  ;;  %s2654_s19 = sadd.s32 1, %s2592_s18   ;;  %s2592_s18 = sphi %s2639_s18, %s3064_s18   ;;  %s2588_s17 = sphi %s2637_s17, %s3068_s17   ;;  %s2584_s16 = sphi %s2635_s16, %s3067_s16   ;;  %s2580_s15 = sphi %s2633_s15, %s3066_s15  }
   0xb   : > { %3040 = sst [smem:[#allocation16_spill]] %s2592_s18  ;;  %s31_s20 = sadd.s32 1, %s2588_s17 }
   0xc   : > { %3041 = sst [smem:[#allocation17_spill]] %s2654_s19  ;;  %s28_s21 = ssub.s32 %s2592_s18, %s2654_s19 }
   0xd   : > { %p3027_p0 = scmp.ne.s32.totalorder %s2588_s17, %s2584_s16  ;;  %p29_p1 = scmp.eq.s32.totalorder %s28_s21, 0 }
   0xe   : > { %p39_p2 = scmp.eq.s32.totalorder %s2592_s18, 0  ;;  %p2349_p4 = scmp.lt.s32.totalorder %s2592_s18, 2 }
   0xf   : > { %s2665_s22 = scalar_select %p29_p1, %s2588_s17, %s31_s20  }
  0x10   : > { %p40_p5 = por %p39_p2, %p3027_p0  ;;  %s3028_s23 = sand.u32 1, %s2588_s17  }
  0x11   : > { %3042 = sst [smem:[#allocation18_spill]] %s2665_s22  ;;  %s2673_s24 = sshll.u32 %s3028_s23, 3 }
  0x12   : > { %s2676_s25 = sshll.u32 %s2592_s18, 7  ;;  %p2678_p6 = pnand %p2349_p4, %p40_p5 }
  0x13   : > { %s198_s27 = sand.u32 1, %s2592_s18   ;;  %s3044_s1 = sld [smem:[#allocation20_spill]] }
  0x14   : > { %s202_s5 = scalar_lea.vmem [#allocation5], %s2673_s24  ;;  %s2690_s7 = scalar_lea.sflag [#allocation6], %s198_s27 }
  0x15   : > { %s209_s6 = sshll.u32 %s202_s5, 4  ;;  %p2696_p8 = pneg %p2678_p6  ;;  %s210_s6 = int_to_ptr.vmem [resolvable:$true] %s209_s6 }
  0x19   : > { %s2687_s30 = scalar_lea.hbm %s3044_s1, %s2676_s25  ;;  %s2415_s12 = scalar_lea.hbm %s3044_s1, 256 }
  0x1a   : > { %s2410_s8 = scalar_lea.hbm %s2687_s30, 128  ;;  %p2416_p11 = scmp.lt.s32.totalorder %s2687_s30, %s3044_s1 }
  0x1b   : > { %p2411_p7 = scmp.ne.s32.totalorder %s2687_s30, %s2410_s8  ;;  %p2417_p12 = scmp.lt.s32.totalorder %s2415_s12, %s2410_s8 }
  0x1d   : > { %p2413_p9 = pnand %p2696_p8, %p2411_p7  ;;  %p2418_p13 = por %p2417_p12, %p2416_p11 }
  0x1f   : > { %p2414_p10 = pneg %p2413_p9 }
  0x21   : > { %p2419_p1 = pnand %p2418_p13, %p2414_p10 }
  0x23   : > { %2422 = shalt.err (!%p2419_p1)
}
  0x24   : > { %s2423_s20 = scalar_lea.vmem %s210_s6, 128  ;;  %s2594_s21 = smov [#allocation5]  }
  0x25   : > { %p2424_p2 = scmp.ne.s32.totalorder %s210_s6, %s2423_s20  ;;  %s2428_s27 = sshll.u32 %s2594_s21, 4  ;;  %s2429_s27 = int_to_ptr.vmem [resolvable:$false] %s2428_s27 }
  0x26   : > { %s2430_s28 = scalar_lea.vmem %s2429_s27, 256  ;;  %p2431_p7 = scmp.lt.s32.totalorder %s210_s6, %s2429_s27 }
  0x27   : > { %p2426_p4 = pnand %p2424_p2, %p2696_p8  ;;  %p2432_p9 = scmp.lt.s32.totalorder %s2430_s28, %s2423_s20 }
  0x29   : > { %p2427_p5 = pneg %p2426_p4  ;;  %p2433_p3 = por %p2432_p9, %p2431_p7 }
  0x2b   : > { %p2434_p0 = pnand %p2433_p3, %p2427_p5 }
  0x2d   : > { %2437 = shalt.err (!%p2434_p0)
}
  0x2e   : > { %2340 = dma.hbm_to_vmem [thread:$0]  (!%p2678_p6), %s2687_s30, 128, %s210_s6, %s2690_s7  }
  0x2f   : > { %s2716_s29 = sadd.s32 4294967295, %s2592_s18   ;;  %s2000_s5 = sadd.s32 4294967294, %s2592_s18  }
  0x30   : > { %p44_p0 = scmp.ne.s32.totalorder %s2584_s16, %s2580_s15  ;;  %p3029_p3 = scmp.eq.s32.totalorder %s2716_s29, 0 }
  0x31   : > { %p141_p10 = scmp.eq.s32.totalorder %s2716_s29, 1  ;;  %p147_p11 = scmp.eq.s32.totalorder %s2000_s5, 1 }
  0x32   : > { %p2725_p12 = por %p3029_p3, %p44_p0  ;;  %p2001_p13 = scmp.ge.s32.totalorder %s2592_s18, 1 }
  0x33   : > { %p3047_p1 = scmp.ne.s32.totalorder %s2588_s17, %s2584_s16  ;;  %p2737_p4 = por %p147_p11, %p44_p0 }
  0x34   : > { %s3046_s8 = scalar_select %p2725_p12, 1, 0 }
  0x35   : > { %p2733_p2 = por %p141_p10, %p3047_p1  ;;  %p154_p5 = scmp.lt.s32.totalorder %s2592_s18, 3 }
  0x36   : > { %s3049_s6 = scalar_select %p2737_p4, 1, 0 }
  0x37   : > { %s3048_s30 = scalar_select %p2733_p2, 1, 0 }
  0x38   : > { %3050 = sst [smem:[#allocation19_spill]] %s3049_s6  ;;  %p2742_p7 = pnand %p2001_p13, %p154_p5 }
  0x39   : > { %s2595_s11 = smov [#allocation8]   ;;  %s2752_s20 = scalar_lea.hbm %s3022_s0, %s2676_s25 }
  0x3a   : > { %s3051_s10 = scalar_select %p2742_p7, 1, 0 }
  0x3b   : > { %s166_s12 = sshll.u32 %s2595_s11, 4  ;;  %p2330_p9 = pneg %p2742_p7  ;;  %s167_s12 = int_to_ptr.vmem [resolvable:$true] %s166_s12 }
  0x3c   : > { %s184_s27 = scalar_lea.vmem [#allocation2], %s2673_s24  ;;  %s2767_s23 = scalar_lea.hbm %s3024_s2, %s2676_s25 }
  0x3d   : > { %p2756_p0 = pnand %p2330_p9, %p3029_p3  ;;  %s191_s28 = sshll.u32 %s184_s27, 4  ;;  %s2761_s28 = int_to_ptr.vmem [resolvable:$true] %s191_s28 }
  0x3e   : > { %s2449_s13 = scalar_lea.vmem %s167_s12, 6144  ;;  %p2457_p5 = scmp.lt.s32.totalorder %s167_s12, %s167_s12 }
  0x3f   : > { %p2440_p10 = pneg %p2756_p0  ;;  %p2450_p11 = scmp.ne.s32.totalorder %s167_s12, %s2449_s13 }
  0x40   : > { %p2458_p9 = scmp.lt.s32.totalorder %s2449_s13, %s2449_s13 }
  0x41   : > { %p2452_p13 = pnand %p2450_p11, %p2440_p10 }
  0x42   : > { %p2459_p3 = por %p2458_p9, %p2457_p5 }
  0x43   : > { %p2453_p1 = pneg %p2452_p13 }
  0x45   : > { %p2460_p4 = pnand %p2459_p3, %p2453_p1 }
  0x47   : > { %2463 = shalt.err (!%p2460_p4)
}
  0x48   : > { %s2596_s14 = smov 128   ;;  %s2597_s25 = smov 8  }
  0x49   : > { %2333 = dma.hbm_to_vmem [thread:$0]  (!%p2756_p0), %s3025_s3, 6144, %s167_s12, [#allocation9], %s2596_s14, %s2596_s14, %s2597_s25  }
  0x4a   : > { %s3053_s11 = sand.u32 1, %s2588_s17   ;;  %s2464_s22 = scalar_lea.hbm %s2752_s20, 128 }
  0x4b   : > { %s181_s1 = scalar_lea.sflag [#allocation3], %s3053_s11  ;;  %p2465_p10 = scmp.ne.s32.totalorder %s2752_s20, %s2464_s22 }
  0x4c   : > { %s2469_s18 = scalar_lea.hbm %s3022_s0, 256  ;;  %p2470_p11 = scmp.lt.s32.totalorder %s2752_s20, %s3022_s0 }
  0x4d   : > { %p2467_p3 = pnand %p2465_p10, %p2696_p8  ;;  %p2471_p13 = scmp.lt.s32.totalorder %s2469_s18, %s2464_s22 }
  0x4f   : > { %p2468_p4 = pneg %p2467_p3  ;;  %p2472_p1 = por %p2471_p13, %p2470_p11 }
  0x51   : > { %p2473_p5 = pnand %p2472_p1, %p2468_p4 }
  0x53   : > { %2476 = shalt.err (!%p2473_p5)
}
  0x54   : > { %s2477_s12 = scalar_lea.vmem %s2761_s28, 128  ;;  %s2598_s21 = smov [#allocation2]  }
  0x55   : > { %p2478_p0 = scmp.ne.s32.totalorder %s2761_s28, %s2477_s12  ;;  %s2482_s19 = sshll.u32 %s2598_s21, 4  ;;  %s2483_s19 = int_to_ptr.vmem [resolvable:$false] %s2482_s19 }
  0x56   : > { %s2484_s14 = scalar_lea.vmem %s2483_s19, 256  ;;  %p2485_p3 = scmp.lt.s32.totalorder %s2761_s28, %s2483_s19 }
  0x57   : > { %p2480_p9 = pnand %p2478_p0, %p2696_p8  ;;  %p2486_p2 = scmp.lt.s32.totalorder %s2484_s14, %s2477_s12 }
  0x59   : > { %p2481_p10 = pneg %p2480_p9  ;;  %p2487_p12 = por %p2486_p2, %p2485_p3 }
  0x5b   : > { %p2488_p7 = pnand %p2487_p12, %p2481_p10 }
  0x5d   : > { %2491 = shalt.err (!%p2488_p7)
}
  0x5e   : > { %2337 = dma.hbm_to_vmem [thread:$0]  (!%p2678_p6), %s2752_s20, 128, %s2761_s28, %s181_s1  }
  0x5f   : > { %s220_s15 = scalar_lea.vmem [#allocation7], %s2673_s24  ;;  %s2492_s22 = scalar_lea.hbm %s2767_s23, 128 }
  0x60   : > { %s227_s18 = sshll.u32 %s220_s15, 4  ;;  %p2493_p4 = scmp.ne.s32.totalorder %s2767_s23, %s2492_s22  ;;  %s228_s18 = int_to_ptr.vmem [resolvable:$true] %s227_s18 }
  0x61   : > { %s2497_s27 = scalar_lea.hbm %s3024_s2, 256  ;;  %p2498_p12 = scmp.lt.s32.totalorder %s2767_s23, %s3024_s2 }
  0x62   : > { %p2495_p11 = pnand %p2493_p4, %p2696_p8  ;;  %p2499_p7 = scmp.lt.s32.totalorder %s2497_s27, %s2492_s22 }
  0x64   : > { %p2496_p2 = pneg %p2495_p11  ;;  %p2500_p13 = por %p2499_p7, %p2498_p12 }
  0x66   : > { %p2501_p1 = pnand %p2500_p13, %p2496_p2 }
  0x68   : > { %2504 = shalt.err (!%p2501_p1)
}
  0x69   : > { %s2505_s1 = scalar_lea.vmem %s228_s18, 128  ;;  %s2599_s24 = smov [#allocation7]  }
  0x6a   : > { %p2506_p5 = scmp.ne.s32.totalorder %s228_s18, %s2505_s1  ;;  %s2510_s20 = sshll.u32 %s2599_s24, 4  ;;  %s2511_s20 = int_to_ptr.vmem [resolvable:$false] %s2510_s20 }
  0x6b   : > { %s2512_s28 = scalar_lea.vmem %s2511_s20, 256  ;;  %p2513_p10 = scmp.lt.s32.totalorder %s228_s18, %s2511_s20 }
  0x6c   : > { %p2508_p0 = pnand %p2506_p5, %p2696_p8  ;;  %p2514_p3 = scmp.lt.s32.totalorder %s2512_s28, %s2505_s1 }
  0x6e   : > { %p2509_p9 = pneg %p2508_p0  ;;  %p2515_p4 = por %p2514_p3, %p2513_p10 }
  0x70   : > { %p2516_p11 = pnand %p2515_p4, %p2509_p9 }
  0x72   : > { %2519 = shalt.err (!%p2516_p11)
}
  0x73   : > { %2343 = dma.hbm_to_vmem [thread:$0]  (!%p2678_p6), %s2767_s23, 128, %s228_s18, %s2690_s7  }
  0x74   : > { %p3054_p2 = scmp.ne.s32.totalorder %s3051_s10, 0 }
  0x75   : > { %s2819_s9 = sand.u32 (!%p3054_p2), 1, %s2584_s16   ;;  %p3055_p8 = scmp.ne.s32.totalorder (!%p3054_p2), %s3046_s8, 0 }
  0x76   : > { %236 = sbr.rel (%p3054_p2) target bundleno = 1743 (0x6cf), region = 36  ;;  %s2822_s13 = sshll.u32 (!%p3054_p2), %s2819_s9, 3 }
  0x77   : > { %s239_s12 = scalar_lea.sflag (!%p3054_p2), [#allocation3], %s2819_s9  ;;  %s242_s21 = scalar_lea.vmem (!%p3054_p2), [#allocation2], %s2822_s13 }
  0x7b   : > { %2563 = dma.done.wait (%p3055_p8), %s239_s12, 128  }
  0x7c   : > { %2565 = vsyncadd (%p3055_p8), %s239_s12, 4294967168  ;;  %s247_s23 = sand.u32 1, %s2716_s29   ;;  %s251_s7 = scalar_lea.vmem [#allocation5], %s2822_s13 }
  0x7d   : > { %s248_s26 = scalar_lea.sflag [#allocation6], %s247_s23 }
  0x7e   : > { %2567 = dma.done.wait (%p3055_p8), %s248_s26, 256  }
  0x7f   : > { %2569 = vsyncadd (%p3055_p8), %s248_s26, 4294967040  ;;  %s260_s10 = scalar_lea.vmem [#allocation7], %s2822_s13  ;;  %p3056_p6 = scmp.eq.s32.totalorder %s2716_s29, 0 }
  0x81   : > { %2571 = dma.done.wait (%p3056_p6), [#allocation9], 6144   ;;  %p3057_p12 = pmov %p3056_p6 }
  0x82   : > { %v2600_v0 = vmov 0.0   ;;  %vm2601_vm0 = vmmov 0   ;;  %v402_v1 = vld [vmem:[#allocation8 + $0xf8] sm:$0xff]  ;;  %v401_v2 = vld [vmem:[#allocation8 + $0xf0] sm:$0xff]  ;;  %v400_v4 = vld [vmem:[#allocation8 + $0xe8] sm:$0xff]  ;;  %s2602_s8 = smov 32  }
  0x83   : > { %2573 = vsyncadd (%p3057_p12), [#allocation9], 4294961152  ;;  %2172 = vmatprep.subr.mxu1 %v2600_v0  ;;  %2204 = vmatprep.mubr.msk.f32.mxu1 %vm2601_vm0, %v2600_v0  ;;  %v315_v3 = vld [vmem:[#allocation8 + $0x78] sm:$0xff]  ;;  %v314_v5 = vld [vmem:[#allocation8 + $0x70] sm:$0xff]  ;;  %s2603_s19 = smov 96   ;;  %s2604_s14 = smov 64  }
  0x84   : > { %2137 = vmatprep.subr.mxu0 %v2600_v0  ;;  %2169 = vmatprep.mubr.msk.f32.mxu0 %vm2601_vm0, %v2600_v0  ;;  %v399_v6 = vld [vmem:[#allocation8 + $0xe0] sm:$0xff]  ;;  %v313_v7 = vld [vmem:[#allocation8 + $0x68] sm:$0xff]  ;;  %v398_v8 = vld [vmem:[#allocation8 + $0xd8] sm:$0xff]  ;;  %vm715_vm1 = vcmask 261120   ;;  %vm1008_vm2 = vcmask 64512   ;;  %vm1858_vm3 = vcmask 523264  }
  0x85   : > { %2173 = vmatpush3.xpose.msra.mxu1 %v402_v1  ;;  %2138 = vmatpush3.xpose.msra.mxu0 %v315_v3  ;;  %v312_v9 = vld [vmem:[#allocation8 + $0x60] sm:$0xff]  ;;  %v397_v10 = vld [vmem:[#allocation8 + $0xd0] sm:$0xff]  ;;  %v311_v11 = vld [vmem:[#allocation8 + $0x58] sm:$0xff]  ;;  %s2043_s15 = sshll.u32 %s2716_s29, 7  ;;  %s298_s18 = scalar_lea.vmem [#allocation10], %s2822_s13  ;;  %vm1860_vm4 = vcmask 785408  }
  0x86   : > { %2174 = vmatprep.subr.mxu1 %v2600_v0  ;;  %2139 = vmatprep.subr.mxu0 %v2600_v0  ;;  %v396_v12 = vld [vmem:[#allocation8 + $0xc8] sm:$0xff]  ;;  %v310_v13 = vld [vmem:[#allocation8 + $0x50] sm:$0xff]  ;;  %v395_v14 = vld [vmem:[#allocation8 + $0xc0] sm:$0xff]  ;;  %s1877_s22 = sshll.u32 %s298_s18, 4  ;;  %s2985_s27 = scalar_lea.hbm %s3026_s4, %s2043_s15  ;;  %s1878_s22 = int_to_ptr.vmem [resolvable:$true] %s1877_s22 }
  0x87   : > { %v309_v15 = vld [vmem:[#allocation8 + $0x48] sm:$0xff]  ;;  %v394_v16 = vld [vmem:[#allocation8 + $0xb8] sm:$0xff]  ;;  %v308_v17 = vld [vmem:[#allocation8 + $0x40] sm:$0xff]  ;;  %s1864_s5 = scalar_lea.sflag [#allocation4], %s2819_s9  ;;  %s2520_s11 = scalar_lea.vmem %s1878_s22, 128 }
  0x88   : > { %v393_v18 = vld [vmem:[#allocation8 + $0xb0] sm:$0xff]  ;;  %v307_v19 = vld [vmem:[#allocation8 + $0x38] sm:$0xff]  ;;  %v392_v20 = vld [vmem:[#allocation8 + $0xa8] sm:$0xff]  ;;  %p2521_p7 = scmp.ne.s32.totalorder %s1878_s22, %s2520_s11  ;;  %p3058_p13 = scmp.ne.s32.totalorder %s3048_s30, 0 }
  0x89   : > { %2175 = vmatpush3.xpose.msra.mxu1 %v401_v2  ;;  %2140 = vmatpush3.xpose.msra.mxu0 %v314_v5  ;;  %v306_v21 = vld [vmem:[#allocation8 + $0x30] sm:$0xff]  ;;  %v391_v22 = vld [vmem:[#allocation8 + $0xa0] sm:$0xff]  ;;  %v305_v23 = vld [vmem:[#allocation8 + $0x28] sm:$0xff]  ;;  %s2607_s29 = smov [#allocation10]  }
  0x8a   : > { %2176 = vmatprep.subr.mxu1 %v2600_v0  ;;  %2141 = vmatprep.subr.mxu0 %v2600_v0  ;;  %v390_v24 = vld [vmem:[#allocation8 + $0x98] sm:$0xff]  ;;  %v304_v25 = vld [vmem:[#allocation8 + $0x20] sm:$0xff]  ;;  %v389_v26 = vld [vmem:[#allocation8 + $0x90] sm:$0xff]  ;;  %p2522_p1 = pnand %p2521_p7, %p3058_p13  ;;  %s2524_s1 = sshll.u32 %s2607_s29, 4  ;;  %s2525_s1 = int_to_ptr.vmem [resolvable:$false] %s2524_s1 }
  0x8b   : > { %v303_v27 = vld [vmem:[#allocation8 + $0x18] sm:$0xff]  ;;  %v388_v28 = vld [vmem:[#allocation8 + $0x88] sm:$0xff]  ;;  %v302_v29 = vld [vmem:[#allocation8 + $0x10] sm:$0xff]  ;;  %s2526_s24 = scalar_lea.vmem %s2525_s1, 256  ;;  %p2527_p0 = scmp.lt.s32.totalorder %s1878_s22, %s2525_s1 }
  0x8c   : > { %v387_v30 = vld [vmem:[#allocation8 + $0x80] sm:$0xff]  ;;  %v301_v31 = vld [vmem:[#allocation8 + $0x8] sm:$0xff]  ;;  %v299_v34 = vld [vmem:[%s242_s21] sm:$0xff]  ;;  %p2523_p5 = pneg %p2522_p1  ;;  %p2528_p9 = scmp.lt.s32.totalorder %s2526_s24, %s2520_s11 }
  0x8d   : > { %2177 = vmatpush3.xpose.msra.mxu1 %v400_v4  ;;  %2142 = vmatpush3.xpose.msra.mxu0 %v313_v7  ;;  %v386_v32 = vld [vmem:[%s251_s7] sm:$0xff]  ;;  %v489_v40 = vld [vmem:[#allocation8 + $0x178] sm:$0xff]  ;;  %v488_v42 = vld [vmem:[#allocation8 + $0x170] sm:$0xff] }
  0x8e   : > { %2178 = vmatprep.subr.mxu1 %v2600_v0  ;;  %2143 = vmatprep.subr.mxu0 %v2600_v0  ;;  %v300_v33 = vld [vmem:[#allocation8] sm:$0xff]  ;;  %v487_v43 = vld [vmem:[#allocation8 + $0x168] sm:$0xff]  ;;  %v485_v46 = vld [vmem:[#allocation8 + $0x158] sm:$0xff]  ;;  %p2529_p10 = por %p2528_p9, %p2527_p0 }
  0x8f   : > { %v486_v44 = vld [vmem:[#allocation8 + $0x160] sm:$0xff]  ;;  %v484_v47 = vld [vmem:[#allocation8 + $0x150] sm:$0xff]  ;;  %v483_v48 = vld [vmem:[#allocation8 + $0x148] sm:$0xff] }
  0x90   : > { %v482_v49 = vld [vmem:[#allocation8 + $0x140] sm:$0xff]  ;;  %v481_v50 = vld [vmem:[#allocation8 + $0x138] sm:$0xff]  ;;  %v480_v52 = vld [vmem:[#allocation8 + $0x130] sm:$0xff]  ;;  %p2530_p3 = pnand %p2529_p10, %p2523_p5 }
  0x91   : > { %2179 = vmatpush3.xpose.msra.mxu1 %v399_v6  ;;  %2144 = vmatpush3.xpose.msra.mxu0 %v312_v9  ;;  %v479_v54 = vld [vmem:[#allocation8 + $0x128] sm:$0xff]  ;;  %v478_v56 = vld [vmem:[#allocation8 + $0x120] sm:$0xff]  ;;  %v477_v58 = vld [vmem:[#allocation8 + $0x118] sm:$0xff] }
  0x92   : > { %2180 = vmatprep.subr.mxu1 %v2600_v0  ;;  %2145 = vmatprep.subr.mxu0 %v2600_v0  ;;  %v476_v59 = vld [vmem:[#allocation8 + $0x110] sm:$0xff]  ;;  %v475_v60 = vld [vmem:[#allocation8 + $0x108] sm:$0xff]  ;;  %v474_v61 = vld [vmem:[#allocation8 + $0x100] sm:$0xff] }
  0x93   : > { %v473_v62 = vld [vmem:[%s260_s10] sm:$0xff] }
  0x95   : > { %2181 = vmatpush3.xpose.msra.mxu1 %v398_v8  ;;  %2146 = vmatpush3.xpose.msra.mxu0 %v311_v11 }
  0x96   : > { %2182 = vmatprep.subr.mxu1 %v2600_v0  ;;  %2147 = vmatprep.subr.mxu0 %v2600_v0 }
  0x99   : > { %2183 = vmatpush3.xpose.msra.mxu1 %v397_v10  ;;  %2148 = vmatpush3.xpose.msra.mxu0 %v310_v13 }
  0x9a   : > { %2184 = vmatprep.subr.mxu1 %v2600_v0  ;;  %2149 = vmatprep.subr.mxu0 %v2600_v0 }
  0x9d   : > { %2185 = vmatpush3.xpose.msra.mxu1 %v396_v12  ;;  %2150 = vmatpush3.xpose.msra.mxu0 %v309_v15 }
  0x9e   : > { %2186 = vmatprep.subr.mxu1 %v2600_v0  ;;  %2151 = vmatprep.subr.mxu0 %v2600_v0 }
  0xa1   : > { %2187 = vmatpush3.xpose.msra.mxu1 %v395_v14  ;;  %2152 = vmatpush3.xpose.msra.mxu0 %v308_v17 }
  0xa2   : > { %2188 = vmatprep.subr.mxu1 %v2600_v0  ;;  %2153 = vmatprep.subr.mxu0 %v2600_v0 }
  0xa5   : > { %2189 = vmatpush3.xpose.msra.mxu1 %v394_v16  ;;  %2154 = vmatpush3.xpose.msra.mxu0 %v307_v19 }
  0xa6   : > { %2190 = vmatprep.subr.mxu1 %v2600_v0  ;;  %2155 = vmatprep.subr.mxu0 %v2600_v0 }
  0xa9   : > { %2191 = vmatpush3.xpose.msra.mxu1 %v393_v18  ;;  %2156 = vmatpush3.xpose.msra.mxu0 %v306_v21 }
  0xaa   : > { %2192 = vmatprep.subr.mxu1 %v2600_v0  ;;  %2157 = vmatprep.subr.mxu0 %v2600_v0 }
  0xad   : > { %2193 = vmatpush3.xpose.msra.mxu1 %v392_v20  ;;  %2158 = vmatpush3.xpose.msra.mxu0 %v305_v23 }
  0xae   : > { %2194 = vmatprep.subr.mxu1 %v2600_v0  ;;  %2159 = vmatprep.subr.mxu0 %v2600_v0 }
  0xb1   : > { %2195 = vmatpush3.xpose.msra.mxu1 %v391_v22  ;;  %2160 = vmatpush3.xpose.msra.mxu0 %v304_v25 }
  0xb2   : > { %2196 = vmatprep.subr.mxu1 %v2600_v0  ;;  %2161 = vmatprep.subr.mxu0 %v2600_v0 }
  0xb5   : > { %2197 = vmatpush3.xpose.msra.mxu1 %v390_v24  ;;  %2162 = vmatpush3.xpose.msra.mxu0 %v303_v27 }
  0xb6   : > { %2198 = vmatprep.subr.mxu1 %v2600_v0  ;;  %2163 = vmatprep.subr.mxu0 %v2600_v0 }
  0xb9   : > { %2199 = vmatpush3.xpose.msra.mxu1 %v389_v26  ;;  %2164 = vmatpush3.xpose.msra.mxu0 %v302_v29 }
  0xba   : > { %2200 = vmatprep.subr.mxu1 %v2600_v0  ;;  %2165 = vmatprep.subr.mxu0 %v2600_v0 }
  0xbd   : > { %2201 = vmatpush3.xpose.msra.mxu1 %v388_v28  ;;  %2166 = vmatpush3.xpose.msra.mxu0 %v301_v31 }
  0xbe   : > { %2202 = vmatprep.subr.mxu1 %v2600_v0  ;;  %2167 = vmatprep.subr.mxu0 %v2600_v0 }
  0xc1   : > { %2203 = vmatpush3.xpose.msra.mxu1 %v387_v30  ;;  %2168 = vmatpush3.xpose.msra.mxu0 %v300_v33 }
  0xc2   : > { %2242 = vmatprep.subr.mxu1 %v2600_v0  ;;  %2207 = vmatprep.subr.mxu0 %v2600_v0 }
  0xc4   : > { %2205 = vmatmul.mubr.f32.vlgmr.msra.gmra.mxu1 %v386_v32  ;;  %2170 = vmatmul.mubr.f32.vlgmr.msra.gmra.mxu0 %v299_v34 }
  0xc5   : > { %2250 = vmatprep.mubr.msk.f32.mxu1 %vm2601_vm0, %v2600_v0  ;;  %2239 = vmatprep.mubr.msk.f32.mxu0 %vm2601_vm0, %v2600_v0 }
  0xc6   : > { %2208 = vmatpush3.xpose.msra.mxu0 %v489_v40 }
  0xc7   : > { %2209 = vmatprep.subr.mxu0 %v2600_v0 }
  0xca   : > { %2210 = vmatpush3.xpose.msra.mxu0 %v488_v42 }
  0xcb   : > { %2211 = vmatprep.subr.mxu0 %v2600_v0 }
  0xce   : > { %2212 = vmatpush3.xpose.msra.mxu0 %v487_v43 }
  0xcf   : > { %2213 = vmatprep.subr.mxu0 %v2600_v0 }
  0xd2   : > { %2214 = vmatpush3.xpose.msra.mxu0 %v486_v44 }
  0xd3   : > { %2215 = vmatprep.subr.mxu0 %v2600_v0 }
  0xd6   : > { %2216 = vmatpush3.xpose.msra.mxu0 %v485_v46 }
  0xd7   : > { %2217 = vmatprep.subr.mxu0 %v2600_v0 }
  0xda   : > { %2218 = vmatpush3.xpose.msra.mxu0 %v484_v47 }
  0xdb   : > { %2219 = vmatprep.subr.mxu0 %v2600_v0 }
  0xde   : > { %2220 = vmatpush3.xpose.msra.mxu0 %v483_v48 }
  0xdf   : > { %2221 = vmatprep.subr.mxu0 %v2600_v0 }
  0xe2   : > { %2222 = vmatpush3.xpose.msra.mxu0 %v482_v49 }
  0xe3   : > { %2223 = vmatprep.subr.mxu0 %v2600_v0 }
  0xe6   : > { %2224 = vmatpush3.xpose.msra.mxu0 %v481_v50 }
  0xe7   : > { %2225 = vmatprep.subr.mxu0 %v2600_v0 }
  0xea   : > { %2226 = vmatpush3.xpose.msra.mxu0 %v480_v52 }
  0xeb   : > { %2227 = vmatprep.subr.mxu0 %v2600_v0 }
  0xee   : > { %2228 = vmatpush3.xpose.msra.mxu0 %v479_v54 }
  0xef   : > { %2229 = vmatprep.subr.mxu0 %v2600_v0 }
  0xf2   : > { %2230 = vmatpush3.xpose.msra.mxu0 %v478_v56 }
  0xf3   : > { %2231 = vmatprep.subr.mxu0 %v2600_v0 }
  0xf6   : > { %2232 = vmatpush3.xpose.msra.mxu0 %v477_v58 }
  0xf7   : > { %2233 = vmatprep.subr.mxu0 %v2600_v0 }
  0xfa   : > { %2234 = vmatpush3.xpose.msra.mxu0 %v476_v59 }
  0xfb   : > { %2235 = vmatprep.subr.mxu0 %v2600_v0 }
  0xfe   : > { %2236 = vmatpush3.xpose.msra.mxu0 %v475_v60 }
  0xff   : > { %2237 = vmatprep.subr.mxu0 %v2600_v0 }
 0x102   : > { %2238 = vmatpush3.xpose.msra.mxu0 %v474_v61 }
 0x105   : > { %2240 = vmatmul.mubr.f32.vlgmr.msra.gmra.mxu0 %v473_v62 }
 0x184   : > { %v469_v35 = vpop.f32.mrf.mxu1  ;;  %v2890_v37 = vpop.f32.mrf.mxu0 }
 0x185   : > { %574 = vrot.lane.b32.xlu1 %v469_v35, %s2602_s8  ;;  %568 = vrot.lane.b32.xlu0 %v469_v35, %s2603_s19 }
 0x186   : > { %v2206_v36 = vpop.f32.mrf.mxu1  ;;  %v2171_v38 = vpop.f32.mrf.mxu0 }
 0x189   : > { %571 = vrot.lane.b32.xlu0 %v469_v35, %s2604_s14  ;;  %561 = vrot.lane.b32.xlu1 %v2890_v37, %s2603_s19 }
 0x18d   : > { %563 = vrot.lane.b32.xlu1 %v2890_v37, %s2604_s14 }
 0x1a7   : > { %587 = vxpose.xlu0.b32.start.end [1/1] (short) (narrow) %v469_v35, 32 }
 0x1c5   : > { %v556_v19 = vpop.f32.mrf.mxu0 }
 0x1c7   : > { %v2241_v20 = vpop.f32.mrf.mxu0 }
 0x1dc   : > { %565 = vrot.lane.b32.xlu0 %v2890_v37, %s2602_s8 }
 0x1f7   : > { %v569_v39 = vpop.permute.xlu0 %568  ;;  %v575_v45 = vpop.permute.xlu1 %574 }
 0x1f8   : > { %619 = vxpose.xlu1.b32.start.end [1/1] (short) (narrow) %v569_v39, 32 }
 0x1fb   : > { %v572_v41 = vpop.permute.xlu0 %571  ;;  %v562_v63 = vpop.permute.xlu1 %561 }
 0x1ff   : > { %v564_v1 = vpop.permute.xlu1 %563 }
 0x205   : > { %651 = vxpose.xlu1.b32.start.end [1/1] (short) (narrow) %v572_v41, 32 }
 0x212   : > { %683 = vxpose.xlu1.b32.start.end [1/1] (short) (narrow) %v575_v45, 32 }
 0x223   : > { %v603_v51 = vpop.trf.xlu0 }
 0x227   : > { %v604_v53 = vpop.trf.xlu0 }
 0x22b   : > { %v605_v55 = vpop.trf.xlu0 }
 0x22f   : > { %v606_v57 = vpop.trf.xlu0 }
 0x230   : > { %2243 = vmatpush3.msra.mxu1 %v606_v57 }
 0x231   : > { %2244 = vmatprep.subr.mxu1 %v2600_v0 }
 0x232   : > { %2245 = vmatpush3.msra.mxu1 %v605_v55 }
 0x233   : > { %2246 = vmatprep.subr.mxu1 %v2600_v0 }
 0x234   : > { %2247 = vmatpush3.msra.mxu1 %v604_v53 }
 0x235   : > { %2248 = vmatprep.subr.mxu1 %v2600_v0 }
 0x236   : > { %2249 = vmatpush3.msra.mxu1 %v603_v51 }
 0x237   : > { %2251 = vmatmul.mubr.msk.f32.vlgmr.msra.gmra.mxu1 %vm715_vm1, %v2890_v37  ;;  %2253 = vmatprep.subr.mxu1 %v2600_v0 }
 0x238   : > { %2261 = vmatprep.mubr.msk.f32.mxu1 %vm2601_vm0, %v2600_v0 }
 0x24e   : > { %v566_v14 = vpop.permute.xlu0 %565 }
 0x274   : > { %v635_v2 = vpop.trf.xlu1 }
 0x278   : > { %v636_v3 = vpop.trf.xlu1 }
 0x27c   : > { %v637_v4 = vpop.trf.xlu1 }
 0x280   : > { %v638_v5 = vpop.trf.xlu1 }
 0x281   : > { %2254 = vmatpush3.msra.mxu1 %v638_v5 }
 0x282   : > { %2255 = vmatprep.subr.mxu1 %v2600_v0 }
 0x283   : > { %2256 = vmatpush3.msra.mxu1 %v637_v4 }
 0x284   : > { %v667_v6 = vpop.trf.xlu1  ;;  %2257 = vmatprep.subr.mxu1 %v2600_v0 }
 0x285   : > { %2258 = vmatpush3.msra.mxu1 %v636_v3 }
 0x286   : > { %2259 = vmatprep.subr.mxu1 %v2600_v0 }
 0x287   : > { %2260 = vmatpush3.msra.mxu1 %v635_v2 }
 0x288   : > { %v668_v7 = vpop.trf.xlu1  ;;  %2262 = vmatmul.mubr.msk.f32.vlgmr.msra.gmra.mxu1 %vm715_vm1, %v562_v63  ;;  %2264 = vmatprep.subr.mxu1 %v2600_v0 }
 0x289   : > { %2272 = vmatprep.mubr.msk.f32.mxu1 %vm2601_vm0, %v2600_v0 }
 0x28c   : > { %v669_v8 = vpop.trf.xlu1 }
 0x290   : > { %v670_v9 = vpop.trf.xlu1 }
 0x291   : > { %2265 = vmatpush3.msra.mxu1 %v670_v9 }
 0x292   : > { %2266 = vmatprep.subr.mxu1 %v2600_v0 }
 0x293   : > { %2267 = vmatpush3.msra.mxu1 %v669_v8 }
 0x294   : > { %v699_v10 = vpop.trf.xlu1  ;;  %2268 = vmatprep.subr.mxu1 %v2600_v0 }
 0x295   : > { %2269 = vmatpush3.msra.mxu1 %v668_v7 }
 0x296   : > { %2270 = vmatprep.subr.mxu1 %v2600_v0 }
 0x297   : > { %2271 = vmatpush3.msra.mxu1 %v667_v6 }
 0x298   : > { %v700_v11 = vpop.trf.xlu1  ;;  %2273 = vmatmul.mubr.msk.f32.vlgmr.msra.gmra.mxu1 %vm715_vm1, %v564_v1  ;;  %2275 = vmatprep.subr.mxu1 %v2600_v0 }
 0x299   : > { %2283 = vmatprep.mubr.msk.f32.mxu1 %vm2601_vm0, %v2600_v0 }
 0x29c   : > { %v701_v12 = vpop.trf.xlu1 }
 0x2a0   : > { %v702_v13 = vpop.trf.xlu1 }
 0x2a1   : > { %2276 = vmatpush3.msra.mxu1 %v702_v13 }
 0x2a2   : > { %2277 = vmatprep.subr.mxu1 %v2600_v0 }
 0x2a3   : > { %2278 = vmatpush3.msra.mxu1 %v701_v12 }
 0x2a4   : > { %2279 = vmatprep.subr.mxu1 %v2600_v0 }
 0x2a5   : > { %2280 = vmatpush3.msra.mxu1 %v700_v11 }
 0x2a6   : > { %2281 = vmatprep.subr.mxu1 %v2600_v0 }
 0x2a7   : > { %2282 = vmatpush3.msra.mxu1 %v699_v10 }
 0x2a8   : > { %2284 = vmatmul.mubr.msk.f32.vlgmr.msra.gmra.mxu1 %vm715_vm1, %v566_v14 }
 0x2f7   : > { %v784_v15 = vpop.f32.mrf.mxu1 }
 0x2f8   : > { %v1004_v16 = vmul.f32 0.17677669, %v784_v15 }
 0x2f9   : > { %v2252_v17 = vpop.f32.mrf.mxu1 }
 0x2fa   : > { %v1009_v18 = vsel %vm1008_vm2, %v1004_v16, -inf }
 0x2fb   : > { %1010 = vmax.xlane.f32.xlu1 %v1009_v18 }
 0x30c   : > { %578 = vrot.lane.b32.xlu1 %v556_v19, %s2603_s19 }
 0x348   : > { %v856_v21 = vpop.f32.mrf.mxu1 }
 0x349   : > { %v1005_v22 = vmul.f32 0.17677669, %v856_v21 }
 0x34a   : > { %v2263_v23 = vpop.f32.mrf.mxu1 }
 0x34b   : > { %v1012_v0 = vsel %vm1008_vm2, %v1005_v22, -inf }
 0x34c   : > { %1013 = vmax.xlane.f32.xlu0 %v1012_v0 }
 0x358   : > { %v928_v24 = vpop.f32.mrf.mxu1 }
 0x359   : > { %v1006_v25 = vmul.f32 0.17677669, %v928_v24 }
 0x35a   : > { %v2274_v26 = vpop.f32.mrf.mxu1 }
 0x35b   : > { %v1015_v27 = vsel %vm1008_vm2, %v1006_v25, -inf }
 0x35c   : > { %1016 = vmax.xlane.f32.xlu0 %v1015_v27 }
 0x368   : > { %v1000_v28 = vpop.f32.mrf.mxu1 }
 0x369   : > { %v1007_v29 = vmul.f32 0.17677669, %v1000_v28 }
 0x36a   : > { %v2285_v30 = vpop.f32.mrf.mxu1 }
 0x36b   : > { %v1018_v31 = vsel %vm1008_vm2, %v1007_v29, -inf }
 0x36c   : > { %1019 = vmax.xlane.f32.xlu0 %v1018_v31 }
 0x382   : > { %581 = vrot.lane.b32.xlu0 %v556_v19, %s2604_s14 }
 0x384   : > { %v1011_v32 = vpop.xlane.xlu1 %1010 }
 0x385   : > { %v1021_v33 = vsub.f32 %v1004_v16, %v1011_v32 }
 0x387   : > { %v1025_v34 = vmul.f32 1.442695, %v1021_v33 }
 0x388   : > { %v579_v56 = vpop.permute.xlu1 %578 }
 0x389   : > { %2394 = vpow2.f32 %v1025_v34 }
 0x396   : > { %v2395_v35 = vpop.eup %2394 }
 0x397   : > { %v1033_v36 = vsel %vm1008_vm2, %v2395_v35, 0.0 }
 0x3a1   : > { %1034 = vadd.xlane.f32.xlu0 %v1033_v36  ;;  %v2605_v36 = vmov 1983009808  }
 0x3d5   : > { %v1014_v37 = vpop.xlane.xlu0 %1013 }
 0x3d6   : > { %v1022_v38 = vsub.f32 %v1005_v22, %v1014_v37  ;;  %v1712_v37 = vunpack.c.l.s4 %v2605_v36 }
 0x3d8   : > { %v1027_v39 = vmul.f32 1.442695, %v1022_v38  ;;  %v1714_v38 = vlaneseq }
 0x3da   : > { %2396 = vpow2.f32 %v1027_v39 }
 0x3e5   : > { %v1017_v40 = vpop.xlane.xlu0 %1016 }
 0x3e6   : > { %v1023_v41 = vsub.f32 %v1006_v25, %v1017_v40  ;;  %v2606_v40 = vmov 1934713408  }
 0x3e7   : > { %v2397_v42 = vpop.eup %2396 }
 0x3e8   : > { %v1029_v43 = vmul.f32 1.442695, %v1023_v41  ;;  %v1036_v44 = vsel %vm1008_vm2, %v2397_v42, 0.0  ;;  %v1744_v41 = vunpack.c.l.s4 %v2606_v40 }
 0x3e9   : > { %1037 = vadd.xlane.f32.xlu0 %v1036_v44 }
 0x3ea   : > { %2398 = vpow2.f32 %v1029_v43  ;;  %v1715_v43 = vshrl.u32 %v1714_v38, 7 }
 0x3f5   : > { %v1020_v47 = vpop.xlane.xlu0 %1019 }
 0x3f6   : > { %v1024_v48 = vsub.f32 %v1007_v29, %v1020_v47 }
 0x3f7   : > { %v2399_v45 = vpop.eup %2398 }
 0x3f8   : > { %v1039_v46 = vsel %vm1008_vm2, %v2399_v45, 0.0  ;;  %v1031_v49 = vmul.f32 1.442695, %v1024_v48 }
 0x3f9   : > { %1040 = vadd.xlane.f32.xlu1 %v1039_v46  ;;  %v582_v52 = vpop.permute.xlu0 %581 }
 0x3fa   : > { %2400 = vpow2.f32 %v1031_v49 }
 0x3ff   : > { %584 = vrot.lane.b32.xlu0 %v556_v19, %s2602_s8 }
 0x407   : > { %v2401_v50 = vpop.eup %2400 }
 0x408   : > { %v1042_v51 = vsel %vm1008_vm2, %v2401_v50, 0.0 }
 0x41e   : > { %1043 = vadd.xlane.f32.xlu0 %v1042_v51 }
 0x42a   : > { %v1035_v53 = vpop.xlane.xlu0 %1034 }
 0x42b   : > { %2402 = vrcp.f32 %v1035_v53 }
 0x42c   : > { %1053 = vxpose.xlu1.b32.start.end [1/1] (short) (narrow) %v556_v19, 32 }
 0x438   : > { %v2403_v54 = vpop.eup %2402 }
 0x439   : > { %1117 = vxpose.xlu1.b32.start.end [1/1] (short) (narrow) %v582_v52, 32  ;;  %v1049_v55 = vmul.f32 %v2403_v54, %v2395_v35 }
 0x43b   : > { %2286 = vmatprep.subr.msk.mxu1 %vm1008_vm2, %v1049_v55 }
 0x43c   : > { %2287 = vmatpush3.xpose.msk.msra.mxu1 %vm1008_vm2, %v1049_v55 }
 0x44b   : > { %1085 = vxpose.xlu0.b32.start.end [1/1] (short) (narrow) %v579_v56, 32 }
 0x472   : > { %v1038_v57 = vpop.xlane.xlu0 %1037 }
 0x473   : > { %2404 = vrcp.f32 %v1038_v57 }
 0x476   : > { %v585_v58 = vpop.permute.xlu0 %584 }
 0x477   : > { %1149 = vxpose.xlu0.b32.start.end [1/1] (short) (narrow) %v585_v58, 32 }
 0x480   : > { %v2405_v59 = vpop.eup %2404 }
 0x481   : > { %v1050_v60 = vmul.f32 %v2405_v59, %v2397_v42  ;;  %v1713_v42 = vunpack.c.0.s8 %v1712_v37 }
 0x482   : > { %v1041_v61 = vpop.xlane.xlu1 %1040 }
 0x483   : > { %2294 = vmatprep.subr.msk.mxu1 %vm1008_vm2, %v1050_v60  ;;  %2406 = vrcp.f32 %v1041_v61  ;;  %v1716_v46 = vsub.s32 %v1713_v42, %v1715_v43 }
 0x490   : > { %v2407_v63 = vpop.eup %2406 }
 0x491   : > { %v1051_v2 = vmul.f32 %v2407_v63, %v2399_v45  ;;  %v1745_v45 = vunpack.c.0.s8 %v1744_v41 }
 0x493   : > { %v1748_v52 = vsub.s32 %v1745_v45, %v1715_v43 }
 0x4a7   : > { %v1044_v5 = vpop.xlane.xlu0 %1043 }
 0x4a8   : > { %v1069_v62 = vpop.trf.xlu1  ;;  %2408 = vrcp.f32 %v1044_v5 }
 0x4a9   : > { %2288 = vmatprep.mubr.msk.f32.mxu1 %vm1008_vm2, %v1069_v62 }
 0x4ac   : > { %v1070_v1 = vpop.trf.xlu1 }
 0x4ad   : > { %2289 = vmatmul.mubr.msk.f32.vlgmr.msra.gmra.mxu1 %vm1008_vm2, %v1070_v1 }
 0x4ae   : > { %2295 = vmatpush3.xpose.msk.msra.mxu1 %vm1008_vm2, %v1050_v60 }
 0x4af   : > { %2302 = vmatprep.subr.msk.mxu1 %vm1008_vm2, %v1051_v2 }
 0x4b0   : > { %v1071_v3 = vpop.trf.xlu1 }
 0x4b1   : > { %2291 = vmatprep.mubr.msk.f32.mxu1 %vm1008_vm2, %v1071_v3 }
 0x4b4   : > { %v1072_v4 = vpop.trf.xlu1 }
 0x4b5   : > { %2292 = vmatmul.mubr.msk.f32.gmra.mxu1 %vm1008_vm2, %v1072_v4  ;;  %v2409_v7 = vpop.eup %2408 }
 0x4b6   : > { %v1052_v10 = vmul.f32 %v2409_v7, %v2401_v50 }
 0x4b8   : > { %v1133_v8 = vpop.trf.xlu1 }
 0x4bc   : > { %v1134_v12 = vpop.trf.xlu1 }
 0x4c0   : > { %v1135_v14 = vpop.trf.xlu1 }
 0x4c4   : > { %v1136_v15 = vpop.trf.xlu1 }
 0x4c7   : > { %v1101_v6 = vpop.trf.xlu0 }
 0x4c8   : > { %2296 = vmatprep.mubr.msk.f32.mxu1 %vm1008_vm2, %v1101_v6 }
 0x4cb   : > { %v1102_v9 = vpop.trf.xlu0 }
 0x4cc   : > { %2297 = vmatmul.mubr.msk.f32.vlgmr.msra.gmra.mxu1 %vm1008_vm2, %v1102_v9 }
 0x4cd   : > { %2303 = vmatpush3.xpose.msk.msra.mxu1 %vm1008_vm2, %v1051_v2 }
 0x4ce   : > { %2310 = vmatprep.subr.msk.mxu1 %vm1008_vm2, %v1052_v10 }
 0x4cf   : > { %v1103_v11 = vpop.trf.xlu0 }
 0x4d0   : > { %2299 = vmatprep.mubr.msk.f32.mxu1 %vm1008_vm2, %v1103_v11 }
 0x4d3   : > { %v1104_v13 = vpop.trf.xlu0 }
 0x4d4   : > { %2300 = vmatmul.mubr.msk.f32.gmra.mxu1 %vm1008_vm2, %v1104_v13 }
 0x4d5   : > { %2304 = vmatprep.mubr.msk.f32.mxu1 %vm1008_vm2, %v1133_v8 }
 0x4d8   : > { %2305 = vmatmul.mubr.msk.f32.vlgmr.msra.gmra.mxu1 %vm1008_vm2, %v1134_v12 }
 0x4d9   : > { %2311 = vmatpush3.xpose.msk.msra.mxu1 %vm1008_vm2, %v1052_v10  ;;  %2307 = vmatprep.mubr.msk.f32.mxu1 %vm1008_vm2, %v1135_v14 }
 0x4dc   : > { %2308 = vmatmul.mubr.msk.f32.gmra.mxu1 %vm1008_vm2, %v1136_v15 }
 0x4f3   : > { %v1165_v16 = vpop.trf.xlu0 }
 0x4f4   : > { %2312 = vmatprep.mubr.msk.f32.mxu1 %vm1008_vm2, %v1165_v16 }
 0x4f7   : > { %v1166_v17 = vpop.trf.xlu0 }
 0x4f8   : > { %2313 = vmatmul.mubr.msk.f32.vlgmr.msra.gmra.mxu1 %vm1008_vm2, %v1166_v17 }
 0x4fb   : > { %v1167_v18 = vpop.trf.xlu0 }
 0x4fc   : > { %2315 = vmatprep.mubr.msk.f32.mxu1 %vm1008_vm2, %v1167_v18 }
 0x4ff   : > { %v1168_v19 = vpop.trf.xlu0 }
 0x500   : > { %2316 = vmatmul.mubr.msk.f32.gmra.mxu1 %vm1008_vm2, %v1168_v19 }
 0x56d   : > { %v2290_v20 = vpop.f32.mrf.mxu1 }
 0x56f   : > { %v1262_v21 = vpop.f32.mrf.mxu1 }
 0x570   : > { %1581 = vxpose.xlu1.b32.start [1/4] (short) (narrow) %v1262_v21, 8 }
 0x574   : > { %1582 = vxpose.xlu1.b32.cont [2/4] (short) (narrow) %v2290_v20, 8 }
 0x575   : > { %v2293_v22 = vpop.f32.mrf.mxu1 }
 0x577   : > { %v1272_v23 = vpop.f32.mrf.mxu1 }
 0x578   : > { %1583 = vxpose.xlu1.b32.cont [3/4] (short) (narrow) %v1272_v23, 8 }
 0x57c   : > { %1584 = vxpose.xlu1.b32.end [4/4] (short) (narrow) %v2293_v22, 8 }
 0x58c   : > { %v2298_v0 = vpop.f32.mrf.mxu1 }
 0x58e   : > { %v1362_v24 = vpop.f32.mrf.mxu1 }
 0x58f   : > { %1613 = vxpose.xlu0.b32.start [1/4] (short) (narrow) %v1362_v24, 8 }
 0x593   : > { %1614 = vxpose.xlu0.b32.cont [2/4] (short) (narrow) %v2298_v0, 8 }
 0x594   : > { %v2301_v25 = vpop.f32.mrf.mxu1 }
 0x596   : > { %v1372_v26 = vpop.f32.mrf.mxu1 }
 0x597   : > { %1615 = vxpose.xlu0.b32.cont [3/4] (short) (narrow) %v1372_v26, 8 }
 0x598   : > { %v2306_v27 = vpop.f32.mrf.mxu1 }
 0x59a   : > { %v1462_v28 = vpop.f32.mrf.mxu1 }
 0x59b   : > { %1645 = vxpose.xlu1.b32.start [1/4] (short) (narrow) %v1462_v28, 8  ;;  %1616 = vxpose.xlu0.b32.end [4/4] (short) (narrow) %v2301_v25, 8 }
 0x59c   : > { %v2309_v29 = vpop.f32.mrf.mxu1 }
 0x59e   : > { %v1472_v30 = vpop.f32.mrf.mxu1 }
 0x59f   : > { %1646 = vxpose.xlu1.b32.cont [2/4] (short) (narrow) %v2306_v27, 8 }
 0x5a3   : > { %1647 = vxpose.xlu1.b32.cont [3/4] (short) (narrow) %v1472_v30, 8 }
 0x5a7   : > { %1648 = vxpose.xlu1.b32.end [4/4] (short) (narrow) %v2309_v29, 8 }
 0x5b8   : > { %v2314_v31 = vpop.f32.mrf.mxu1 }
 0x5ba   : > { %v1562_v32 = vpop.f32.mrf.mxu1 }
 0x5bb   : > { %1677 = vxpose.xlu0.b32.start [1/4] (short) (narrow) %v1562_v32, 8 }
 0x5bf   : > { %1678 = vxpose.xlu0.b32.cont [2/4] (short) (narrow) %v2314_v31, 8 }
 0x5c0   : > { %v2317_v33 = vpop.f32.mrf.mxu1 }
 0x5c2   : > { %v1572_v34 = vpop.f32.mrf.mxu1 }
 0x5c3   : > { %1679 = vxpose.xlu0.b32.cont [3/4] (short) (narrow) %v1572_v34, 8 }
 0x5c7   : > { %1680 = vxpose.xlu0.b32.end [4/4] (short) (narrow) %v2317_v33, 8 }
 0x5ec   : > { %v1597_v35 = vpop.trf.xlu1 }
 0x60b   : > { %v1629_v39 = vpop.trf.xlu0 }
 0x617   : > { %v1661_v44 = vpop.trf.xlu1 }
 0x618   : > { %v1709_v47 = vcombine.low %v1597_v35, %v1661_v44  ;;  %v1710_v48 = vcombine.high %v1597_v35, %v1661_v44 }
 0x61a   : > { %v1717_v53 = vrot.slane %v1709_v47, %v1716_v46  ;;  %v1724_v54 = vrot.slane %v1710_v48, %v1716_v46 }
 0x637   : > { %v1693_v49 = vpop.trf.xlu0 }
 0x638   : > { %v1725_v50 = vcombine.low %v1629_v39, %v1693_v49  ;;  %v1726_v51 = vcombine.high %v1629_v39, %v1693_v49 }
 0x63a   : > { %v1733_v55 = vrot.slane %v1725_v50, %v1716_v46  ;;  %v1740_v56 = vrot.slane %v1726_v51, %v1716_v46 }
 0x63c   : > { %v1741_v57 = vcombine.low %v1717_v53, %v1733_v55  ;;  %v1742_v58 = vcombine.high %v1717_v53, %v1733_v55  ;;  %v1757_v59 = vcombine.low %v1724_v54, %v1740_v56  ;;  %v1758_v60 = vcombine.high %v1724_v54, %v1740_v56 }
 0x63e   : > { %v1749_v61 = vrot.slane %v1741_v57, %v1748_v52  ;;  %v1756_v62 = vrot.slane %v1742_v58, %v1748_v52  ;;  %v1765_v63 = vrot.slane %v1757_v59, %v1748_v52  ;;  %v1772_v1 = vrot.slane %v1758_v60, %v1748_v52 }
 0x640   : > { %v1777_v2 = vcombine.low %v1749_v61, %v1756_v62  ;;  %v2040_v3 = vcombine.high %v1749_v61, %v1756_v62  ;;  %v1793_v4 = vcombine.low %v1765_v63, %v1772_v1  ;;  %v2041_v5 = vcombine.high %v1765_v63, %v1772_v1 }
 0x642   : > { %v1784_v6 = vrot.slane %v1777_v2, %v1716_v46  ;;  %v1792_v7 = vrot.slane %v2040_v3, %v1716_v46  ;;  %v1800_v8 = vrot.slane %v1793_v4, %v1716_v46  ;;  %v1808_v9 = vrot.slane %v2041_v5, %v1716_v46 }
 0x644   : > { %v1810_v10 = vcombine.high %v1784_v6, %v1792_v7  ;;  %v1826_v11 = vcombine.high %v1800_v8, %v1808_v9  ;;  %v1809_v12 = vcombine.low %v1784_v6, %v1792_v7  ;;  %v1825_v13 = vcombine.low %v1800_v8, %v1808_v9 }
 0x646   : > { %v1824_v14 = vrot.slane %v1810_v10, %v1748_v52  ;;  %v1840_v15 = vrot.slane %v1826_v11, %v1748_v52  ;;  %v1817_v16 = vrot.slane %v1809_v12, %v1748_v52  ;;  %v1833_v17 = vrot.slane %v1825_v13, %v1748_v52 }
 0x648   : > { %v1843_v18 = vcombine.low %v1824_v14, %v1840_v15  ;;  %v1842_v19 = vcombine.high %v1817_v16, %v1833_v17  ;;  %v1841_v20 = vcombine.low %v1817_v16, %v1833_v17  ;;  %v1844_v21 = vcombine.high %v1824_v14, %v1840_v15 }
 0x64a   : > { %1850 = vrot.lane.b32.xlu0 %v1843_v18, %s2604_s14  ;;  %1846 = vrot.lane.b32.xlu1 %v1842_v19, %s2602_s8 }
 0x64e   : > { %1854 = vrot.lane.b32.xlu1 %v1844_v21, %s2603_s19 }
 0x6bc   : > { %v1847_v22 = vpop.permute.xlu1 %1846  ;;  %v1851_v23 = vpop.permute.xlu0 %1850 }
 0x6bd   : > { %v1857_v0 = vsel %vm715_vm1, %v1841_v20, %v1847_v22 }
 0x6be   : > { %v1859_v25 = vsel %vm1858_vm3, %v1857_v0, %v1851_v23 }
 0x6c0   : > { %v1855_v24 = vpop.permute.xlu1 %1854 }
 0x6c1   : > { %v1861_v26 = vsel %vm1860_vm4, %v1859_v25, %v1855_v24 }
 0x6c2   : > { %1862 = vst [vmem:[%s298_s18] sm:$0xff] %v1861_v26 }
 0x6c3   : > { %2533 = shalt.err (!%p2530_p3)
}
 0x6c4   : > { %s2534_s20 = scalar_lea.hbm %s2985_s27, 128  ;;  %s2538_s13 = scalar_lea.hbm %s3026_s4, 256 }
 0x6c5   : > { %p2535_p4 = scmp.ne.s32.totalorder %s2985_s27, %s2534_s20  ;;  %p2539_p8 = scmp.lt.s32.totalorder %s2985_s27, %s3026_s4 }
 0x6c6   : > { %p2540_p6 = scmp.lt.s32.totalorder %s2538_s13, %s2534_s20 }
 0x6c7   : > { %p2536_p11 = pnand %p2535_p4, %p3058_p13 }
 0x6c8   : > { %p2541_p12 = por %p2540_p6, %p2539_p8 }
 0x6c9   : > { %p2537_p2 = pneg %p2536_p11 }
 0x6cb   : > { %p2542_p7 = pnand %p2541_p12, %p2537_p2 }
 0x6cd   : > { %2545 = shalt.err (!%p2542_p7)
}
 0x6ce   : > { %2328 = dma.vmem_to_hbm [thread:$0]  (%p3058_p13), %s1878_s22, 128, %s2985_s27, %s1864_s5  }
 0x6cf PF: > { %s3059_s23 = sld [smem:[#allocation15_spill]] }
 0x6d0   : > { %s3060_s26 = sld [smem:[#allocation19_spill]] }
 0x6d1   : > { %s3061_s7 = sld [smem:[#allocation16_spill]] }
 0x6d5   : > { %s1889_s10 = sand.u32 1, %s3059_s23  }
 0x6d6   : > { %p3062_p1 = scmp.ne.s32.totalorder %s3060_s26, 0  ;;  %s1890_s8 = scalar_lea.sflag [#allocation4], %s1889_s10 }
 0x6d7   : > { %p3063_p5 = scmp.ge.s32.totalorder %s3061_s7, 2 }
 0x6d9   : > { %p2345_p0 = pnand %p3063_p5, %p3062_p1 }
 0x6db   : > { %p2346_p9 = pneg %p2345_p0 }
 0x6dd   : > { %2575 = dma.done.wait (%p2346_p9), %s1890_s8, 128  }
 0x6de   : > { %2577 = vsyncadd (%p2346_p9), %s1890_s8, 4294967168  ;;  %s3064_s18 = sld [smem:[#allocation17_spill]]  ;;  %s3066_s15 = smov %s2584_s16 }
 0x6df   : > { %s3065_s19 = sld [smem:[#allocation18_spill]]  ;;  %s3067_s16 = smov %s2588_s17 }
 0x6e4   : > { %p21_p10 = scmp.ge.s32.totalorder %s3064_s18, 4  }
 0x6e5   : > { %s3068_s17 = smov %s3065_s19 }
 0x6e6   :  { %23 = sbr.rel (!%p21_p10) target bundleno = 10 (0xa), region = 109 }
 0x6eb   :  { %1895 = vsyncpa [#allocation3], 1 }
 0x6ec   :  { %1897 = vsyncpa [#allocation3 + $0x1], 1 }
 0x6ed   :  { %1898 = vsyncpa [#allocation6], 1 }
 0x6ee   :  { %1900 = vsyncpa [#allocation6 + $0x1], 1 }
 0x6ef   :  { %1901 = vsyncpa [#allocation9], 1 }
 0x6f0   :  { %1902 = vsyncpa [#allocation4], 1 }
 0x6f1   :  { %1904 = vsyncpa [#allocation4 + $0x1], 1 }

</bundles_post_ra>
